<compile_context>
chip_gen: v7x
topology: tpu7x:2x2x1
jax: 0.10.0
libtpu: 0.0.40
codegen_flags: <defaults>
</compile_context>

<pallas_src>
import functools
import math

import jax
import jax.numpy as jnp
from jax.experimental import pallas as pl
from jax.experimental.pallas import tpu as pltpu


_LINEAR_CONNECTS = ('linear', 'linear_no_bias', 'linear_right')


# ============================================================================
# Pallas kernels
# ============================================================================

def _apply_connect(f, r, s, theta_ref):
    """SEW element-wise connect.  r = block input, s = conv-branch spikes (f32)."""
    if f == 'ADD':
        return r + s
    if f == 'AND':
        return r * s
    if f == 'NAND':
        return 1.0 - r * s
    if f == 'IAND':
        return r * (1.0 - s)
    if f == 'ANDI':
        return (1.0 - r) * s
    if f == 'OR':
        return r + s - r * s
    if f == 'XOR':
        return r * (1.0 - s) + (1.0 - r) * s
    if f == 'NOR':
        return 1.0 - (r + s - r * s)
    if f == 'XNOR':
        return 1.0 - (r * (1.0 - s) + (1.0 - r) * s)
    if f == 'IMPL':
        return 1.0 - r + r * s
    if f == 'RIMPL':
        return 1.0 - s + s * r
    if f in _LINEAR_CONNECTS:
        # torch broadcasts theta over the image width W; theta_ref is already
        # tiled to the flat H*W lane axis: (3, HW).
        t0 = theta_ref[0:1, :]
        t1 = theta_ref[1:2, :]
        t2 = theta_ref[2:3, :]
        if f == 'linear':
            return t0 + t1 * r + t2 * s
        if f == 'linear_no_bias':
            return t1 * r + t2 * s
        return t1 * r + s
    raise NotImplementedError(f)


def conv_unit_kernel(*refs, taps, cin, w_img, has_residual, residual_pre,
                     connect_f, has_theta, has_pool):
    """Fused Conv + BN + ParametricLIF [+ residual / connect] [+ MaxPool].

    Grid is (N, T); T (axis 1) is sequential and carries the LIF membrane.
    """
    it = iter(refs)
    alpha_ref = next(it)                          # SMEM (1,)   sigmoid(plif_w) = 1/tau
    x_ref = next(it)                              # (1, 1, Cin,  HW)  bf16
    r_ref = next(it) if has_residual else None    # (1, 1, Cout, HW)  bf16
    w_ref = next(it)                              # (Cout, KK*Cin)    f32
    scale_ref = next(it)                          # (Cout, 1)  alpha * gamma/sqrt(var+eps)
    shift_ref = next(it)                          # (Cout, 1)  alpha * (beta - mean*scale)
    mask_ref = next(it)                           # (KK, HW)   per-tap border validity
    theta_ref = next(it) if has_theta else None   # (3, HW)
    pool_ref = next(it) if has_pool else None     # (k*k, HW, HWo) 0/1 window selectors
    o_ref = next(it)                              # (1, 1, Cout, HWo) bf16
    p_ref = next(it)                              # VMEM (KK*Cin, HW) f32 im2col scratch
    v_ref = next(it)                              # VMEM (Cout,   HW) f32 LIF membrane

    hw = x_ref.shape[-1]

    # New sample along T: reset the membrane potential.
    @pl.when(pl.program_id(1) == 0)
    def _():
        v_ref[...] = jnp.zeros_like(v_ref)

    alpha = alpha_ref[0]
    x = x_ref[0, 0].astype(jnp.float32)           # (Cin, HW)

    if len(taps) == 1 and taps[0] == (0, 0):
        # 1x1 conv fast path.
        acc = jnp.dot(w_ref[...], x, preferred_element_type=jnp.float32)
    else:
        # im2col: stack KK lane-shifted, border-clipped copies of x (static
        # slices only; untouched scratch columns stay zero = SAME padding),
        # then ONE matmul -> lane-dense (Cout, HW) tile.
        p_ref[...] = jnp.zeros_like(p_ref)
        for tap, (dy, dx) in enumerate(taps):
            off = dy * w_img + dx
            lo = max(0, -off)
            hi = hw - max(0, off)
            piece = x[:, lo + off:hi + off]
            if dx != 0:                           # kill columns wrapping across rows
                piece = piece * mask_ref[tap:tap + 1, lo:hi]
            p_ref[tap * cin:(tap + 1) * cin, lo:hi] = piece
        acc = jnp.dot(w_ref[...], p_ref[...], preferred_element_type=jnp.float32)

    # Folded BatchNorm, pre-multiplied by alpha (= 1/tau).
    drive = acc * scale_ref[...] + shift_ref[...]

    r = None
    if has_residual:
        r = r_ref[0, 0].astype(jnp.float32)
        if residual_pre:                          # BasicBlock: sn(x + conv(x))
            drive = drive + alpha * r

    # ParametricLIF: v <- v + alpha*(input - v); spike at v_th = 1; hard reset to 0.
    v = (1.0 - alpha) * v_ref[...] + drive
    spike = (v >= 1.0).astype(jnp.float32)
    v_ref[...] = v * (1.0 - spike)

    o = spike
    if has_residual and not residual_pre:         # SEWBlock connect
        o = _apply_connect(connect_f, r, spike, theta_ref)

    if has_pool:
        # k x k, stride-k max pool: k^2 exact 0/1 selection matmuls + max.
        pooled = None
        for idx in range(pool_ref.shape[0]):
            cand = jnp.dot(o, pool_ref[idx], preferred_element_type=jnp.float32)
            pooled = cand if pooled is None else jnp.maximum(pooled, cand)
        o = pooled

    o_ref[0, 0] = o.astype(o_ref.dtype)


def head_kernel(x_ref, w_ref, b_ref, o_ref, *, inv_t):
    """Fused time-mean + Linear: out = mean_t(x_t) @ W + b (single grid step)."""
    feats = jnp.sum(x_ref[...].astype(jnp.float32), axis=0) * inv_t      # (N, F)
    o_ref[...] = jnp.dot(feats, w_ref[...],
                         preferred_element_type=jnp.float32) + b_ref[...]


# ============================================================================
# Pallas wrappers
# ============================================================================

def conv_unit_apply(u, x, r):
    """x: [T, N, Cin, HW] bf16 -> [T, N, Cout, HWo] bf16 (one fused pallas_call)."""
    t_len, n_len, cin, hw = x.shape
    cout = u['cout']
    hw_out = u['hw_out']
    kkcin = u['w_mat'].shape[1]
    has_pool = u['pool_sel'] is not None

    kernel = functools.partial(
        conv_unit_kernel,
        taps=u['taps'], cin=cin, w_img=u['W'],
        has_residual=r is not None, residual_pre=u['residual_pre'],
        connect_f=u['connect'], has_theta=u['theta'] is not None,
        has_pool=has_pool)

    inputs = [u['alpha'], x]
    in_specs = [
        pl.BlockSpec(memory_space=pltpu.MemorySpace.SMEM),
        pl.BlockSpec((1, 1, cin, hw), lambda n, t: (t, n, 0, 0)),
    ]
    if r is not None:
        inputs.append(r)
        in_specs.append(pl.BlockSpec((1, 1, r.shape[2], hw),
                                     lambda n, t: (t, n, 0, 0)))
    inputs += [u['w_mat'], u['scale_a'], u['shift_a'], u['tap_mask']]
    in_specs += [
        pl.BlockSpec((cout, kkcin), lambda n, t: (0, 0)),
        pl.BlockSpec((cout, 1), lambda n, t: (0, 0)),
        pl.BlockSpec((cout, 1), lambda n, t: (0, 0)),
        pl.BlockSpec(u['tap_mask'].shape, lambda n, t: (0, 0)),
    ]
    if u['theta'] is not None:
        inputs.append(u['theta'])
        in_specs.append(pl.BlockSpec(u['theta'].shape, lambda n, t: (0, 0)))
    if has_pool:
        inputs.append(u['pool_sel'])
        in_specs.append(pl.BlockSpec(u['pool_sel'].shape, lambda n, t: (0, 0, 0)))

    return pl.pallas_call(
        kernel,
        out_shape=jax.ShapeDtypeStruct((t_len, n_len, cout, hw_out), jnp.bfloat16),
        grid=(n_len, t_len),
        in_specs=in_specs,
        out_specs=pl.BlockSpec((1, 1, cout, hw_out), lambda n, t: (t, n, 0, 0)),
        scratch_shapes=[pltpu.VMEM((kkcin, hw), jnp.float32),
                        pltpu.VMEM((cout, hw), jnp.float32)],
        compiler_params=pltpu.CompilerParams(
            dimension_semantics=("parallel", "arbitrary")),
    )(*inputs)


def head_apply(head, feats):
    """feats: [T, N, F] bf16 -> Linear(mean over T) -> [N, num_classes] f32."""
    T, N, F = feats.shape
    C = head['w'].shape[1]
    return pl.pallas_call(
        functools.partial(head_kernel, inv_t=1.0 / T),
        out_shape=jax.ShapeDtypeStruct((N, C), jnp.float32),
        grid=(1,),
        in_specs=[
            pl.BlockSpec((T, N, F), lambda i: (0, 0, 0)),
            pl.BlockSpec((F, C), lambda i: (0, 0)),
            pl.BlockSpec((1, C), lambda i: (0, 0)),
        ],
        out_specs=pl.BlockSpec((N, C), lambda i: (0, 0)),
        compiler_params=pltpu.CompilerParams(dimension_semantics=("arbitrary",)),
    )(feats, head['w'], head['b'].reshape(1, C))


# ============================================================================
# Parameter init (deterministic, synthetic) & model build
# ============================================================================

def init_conv_bn(key, kh, kw, cin, cout):
    ks = jax.random.split(key, 5)
    fan_in = kh * kw * cin
    w = jax.random.normal(ks[0], (kh, kw, cin, cout), jnp.float32) * math.sqrt(2.0 / fan_in)
    gamma = 1.0 + 0.1 * jax.random.normal(ks[1], (cout,), jnp.float32)
    beta = 0.1 * jax.random.normal(ks[2], (cout,), jnp.float32)
    rmean = 0.1 * jax.random.normal(ks[3], (cout,), jnp.float32)
    rvar = 1.0 + 0.1 * jnp.abs(jax.random.normal(ks[4], (cout,), jnp.float32))
    scale = gamma / jnp.sqrt(rvar + 1e-5)
    shift = beta - rmean * scale
    return w, scale, shift


def build_model(key, layer_list, num_classes, in_hw, connect_f):
    in_channels = 2
    raw = []                      # unit dicts and ('pool', k) markers
    for cfg in layer_list:
        channels = cfg['channels']
        mid = cfg.get('mid_channels', channels)
        if in_channels != channels:
            k = cfg['up_kernel_size']
            if k not in (1, 3):
                raise NotImplementedError
            key, sub = jax.random.split(key)
            raw.append(dict(kh=k, kw=k, cin=in_channels, cout=channels, key=sub,
                            save_input=False, use_saved=False, residual_pre=False,
                            connect=None, sew_theta=False))
        in_channels = channels
        if 'num_blocks' in cfg:
            bt = cfg['block_type']
            for _ in range(cfg['num_blocks']):
                key, k1, k2 = jax.random.split(key, 3)
                if bt == 'sew':
                    raw.append(dict(kh=3, kw=3, cin=in_channels, cout=mid, key=k1,
                                    save_input=True, use_saved=False, residual_pre=False,
                                    connect=None, sew_theta=False))
                    raw.append(dict(kh=3, kw=3, cin=mid, cout=in_channels, key=k2,
                                    save_input=False, use_saved=True, residual_pre=False,
                                    connect=connect_f,
                                    sew_theta=connect_f in _LINEAR_CONNECTS))
                elif bt == 'plain':
                    raw.append(dict(kh=3, kw=3, cin=in_channels, cout=mid, key=k1,
                                    save_input=False, use_saved=False, residual_pre=False,
                                    connect=None, sew_theta=False))
                    raw.append(dict(kh=3, kw=3, cin=mid, cout=in_channels, key=k2,
                                    save_input=False, use_saved=False, residual_pre=False,
                                    connect=None, sew_theta=False))
                elif bt == 'basic':
                    raw.append(dict(kh=3, kw=3, cin=in_channels, cout=mid, key=k1,
                                    save_input=True, use_saved=False, residual_pre=False,
                                    connect=None, sew_theta=False))
                    raw.append(dict(kh=3, kw=3, cin=mid, cout=in_channels, key=k2,
                                    save_input=False, use_saved=True, residual_pre=True,
                                    connect=None, sew_theta=False))
                else:
                    raise NotImplementedError(bt)
        if 'k_pool' in cfg:
            raw.append(('pool', cfg['k_pool']))

    # Attach pools to the preceding unit (consecutive pools merge exactly for
    # stride==kernel max pooling) and record per-unit (pre-pool) resolution.
    h = w = in_hw
    units = []
    for item in raw:
        if isinstance(item, tuple):
            k = item[1]
            if not units:
                raise NotImplementedError("pool before the first conv unit")
            units[-1]['pool_k'] *= k
            h //= k
            w //= k
        else:
            u = dict(item)
            u['H'], u['W'] = h, w
            u['pool_k'] = 1
            units.append(u)
    out_features = h * w * in_channels

    # Materialize per-unit constants.
    final = []
    for u in units:
        kh, kw, cin, cout = u['kh'], u['kw'], u['cin'], u['cout']
        H, W = u['H'], u['W']
        HW = H * W
        k_w, k_t = jax.random.split(u['key'])
        w_conv, scale, shift = init_conv_bn(k_w, kh, kw, cin, cout)

        plif_w = jnp.float32(-math.log(2.0 - 1.0))        # init_tau = 2  ->  w = 0
        alpha = jax.nn.sigmoid(plif_w)                    # 1 / tau = 0.5

        # (Cout, KK*Cin), row order matches the im2col scratch (tap-major, ci-minor).
        w_mat = jnp.transpose(w_conv.reshape(kh * kw, cin, cout),
                              (2, 0, 1)).reshape(cout, kh * kw * cin)

        ph, pw = (kh - 1) // 2, (kw - 1) // 2
        hh = jnp.arange(HW, dtype=jnp.int32) // W
        ww = jnp.arange(HW, dtype=jnp.int32) % W
        taps = []
        masks = []
        for ky in range(kh):
            for kx in range(kw):
                dy, dx = ky - ph, kx - pw
                taps.append((dy, dx))
                valid = (((hh + dy) >= 0) & ((hh + dy) < H) &
                         ((ww + dx) >= 0) & ((ww + dx) < W))
                masks.append(valid.astype(jnp.float32))
        tap_mask = jnp.stack(masks)                        # (KK, HW)

        pool_k = u['pool_k']
        if pool_k > 1:
            Ho, Wo = H // pool_k, W // pool_k
            HWo = Ho * Wo
            a = jnp.arange(HWo)
            base = (a // Wo) * pool_k * W + (a % Wo) * pool_k    # window anchors
            sels = []
            for i in range(pool_k):
                for j in range(pool_k):
                    rows = base + i * W + j
                    sels.append(jnp.zeros((HW, HWo), jnp.float32)
                                .at[rows, a].set(1.0))
            pool_sel = jnp.stack(sels)                     # (k*k, HW, HWo)
        else:
            HWo = HW
            pool_sel = None

        if u['sew_theta']:
            kt1, kt2 = jax.random.split(k_t)
            theta_0 = jnp.full((128,), 0.01, jnp.float32)
            theta_1 = 1.0 + 0.05 * jax.random.normal(kt1, (128,), jnp.float32)
            theta_2 = 1.0 + 0.05 * jax.random.normal(kt2, (128,), jnp.float32)
            theta = jnp.stack([jnp.tile(theta_0[:W], H),
                               jnp.tile(theta_1[:W], H),
                               jnp.tile(theta_2[:W], H)])  # (3, HW)
        else:
            theta = None

        final.append(dict(
            cout=cout, W=W, hw_out=HWo, taps=tuple(taps),
            w_mat=w_mat,
            scale_a=(alpha * scale).reshape(cout, 1),
            shift_a=(alpha * shift).reshape(cout, 1),
            alpha=alpha.reshape(1),
            tap_mask=tap_mask,
            pool_sel=pool_sel,
            theta=theta,
            save_input=u['save_input'],
            use_saved=u['use_saved'],
            residual_pre=u['residual_pre'],
            connect=u['connect'],
        ))

    key, kh_, kb_ = jax.random.split(key, 3)
    bound = 1.0 / math.sqrt(out_features)
    head = {
        'w': jax.random.uniform(kh_, (out_features, num_classes), jnp.float32, -bound, bound),
        'b': jax.random.uniform(kb_, (num_classes,), jnp.float32, -bound, bound),
    }
    return final, head


# ============================================================================
# Forward pass
# ============================================================================

def forward(x, units, head):
    # x: [N, T, C, H, W] (torch convention) -> [T, N, C, H*W] bf16
    # (channels on sublanes, flat spatial = lane dim; spikes {0,1} exact in bf16).
    x = jnp.transpose(x, (1, 0, 2, 3, 4)).astype(jnp.bfloat16)
    T, N, C, H, W = x.shape
    x = x.reshape(T, N, C, H * W)
    saved = None
    for u in units:
        if u['save_input']:
            saved = x
        r = saved if u['use_saved'] else None
        x = conv_unit_apply(u, x, r)
    T, N, Cf, HWf = x.shape
    feats = x.reshape(T, N, Cf * HWf)        # == torch Flatten(2), (C, H, W) order
    return head_apply(head, feats)           # mean over T + Linear, fused


# ============================================================================
# Main
# ============================================================================

if __name__ == "__main__":
    key = jax.random.PRNGKey(0)
    kx, kp = jax.random.split(key)

    # Small-but-representative config (DVS: 2 input channels, 11 classes).
    N, T, Cin, H, W = 2, 4, 2, 16, 16
    num_classes = 11
    connect_f = 'ADD'
    layer_list = [
        {'channels': 8,  'up_kernel_size': 3, 'num_blocks': 1, 'block_type': 'sew',   'k_pool': 2},
        {'channels': 8,  'num_blocks': 1, 'block_type': 'plain'},
        {'channels': 16, 'up_kernel_size': 1, 'num_blocks': 1, 'block_type': 'basic', 'k_pool': 2},
    ]

    units, head = build_model(kp, layer_list, num_classes, in_hw=H, connect_f=connect_f)

    # Spike-like binary input events.
    x = (jax.random.uniform(kx, (N, T, Cin, H, W)) < 0.5).astype(jnp.float32)

    y = forward(x, units, head)
    y = jax.block_until_ready(y)
    assert y.shape == (N, num_classes), y.shape
    assert bool(jnp.all(jnp.isfinite(y)))
    print("KERNEL_OK")
</pallas_src>

<mosaic_0001>
module attributes {stable_mosaic.version = 11 : i64} {
  func.func @conv_unit_kernel(%arg0: i32, %arg1: i32, %arg2: memref<1xf32, #tpu.memory_space<smem>>, %arg3: memref<1x1x2x256xbf16, #tpu.memory_space<vmem>>, %arg4: memref<8x18xf32, #tpu.memory_space<vmem>>, %arg5: memref<8x1xf32, #tpu.memory_space<vmem>>, %arg6: memref<8x1xf32, #tpu.memory_space<vmem>>, %arg7: memref<9x256xf32, #tpu.memory_space<vmem>>, %arg8: memref<1x1x8x256xbf16, #tpu.memory_space<vmem>>, %arg9: memref<18x256xf32, #tpu.memory_space<vmem>>, %arg10: memref<8x256xf32, #tpu.memory_space<vmem>>) attributes {dimension_semantics = [#tpu.dimension_semantics<parallel>, #tpu.dimension_semantics<arbitrary>], iteration_bounds = array<i64: 2, 4>, scalar_prefetch = 0 : i64, scratch_operands = 2 : i64, tpu.core_type = #tpu.core_type<tc>, window_params = [{transform_indices = @transform_0, window_bounds = array<i64: 1>}, {transform_indices = @transform_1, window_bounds = array<i64: 1, 1, 2, 256>}, {pipeline_mode = #tpu.pipeline_mode<synchronous>, transform_indices = @transform_2, window_bounds = array<i64: 8, 18>}, {pipeline_mode = #tpu.pipeline_mode<synchronous>, transform_indices = @transform_3, window_bounds = array<i64: 8, 1>}, {pipeline_mode = #tpu.pipeline_mode<synchronous>, transform_indices = @transform_4, window_bounds = array<i64: 8, 1>}, {pipeline_mode = #tpu.pipeline_mode<synchronous>, transform_indices = @transform_5, window_bounds = array<i64: 9, 256>}, {transform_indices = @transform_6, window_bounds = array<i64: 1, 1, 8, 256>}]} {
    %c0_i32 = arith.constant 0 : i32
    %0 = arith.cmpi eq, %arg1, %c0_i32 : i32
    %1 = arith.extui %0 : i1 to i32
    %c0_i32_0 = arith.constant 0 : i32
    %2 = arith.cmpi ne, %1, %c0_i32_0 : i32
    scf.if %2 {
      %cst_44 = arith.constant 0.000000e+00 : f32
      %70 = vector.broadcast %cst_44 : f32 to vector<8x256xf32>
      %c0_45 = arith.constant 0 : index
      %c0_46 = arith.constant 0 : index
      %71 = vector.load %arg10[%c0_45, %c0_46] : memref<8x256xf32, #tpu.memory_space<vmem>>, vector<8x256xf32>
      tpu.vector_store %arg10[%c0_45, %c0_46], %70 {strides = array<i32>} : memref<8x256xf32, #tpu.memory_space<vmem>>, vector<8x256xf32>,
    } else {
    }
    %c0 = arith.constant 0 : index
    %3 = memref.load %arg2[%c0] : memref<1xf32, #tpu.memory_space<smem>>
    %c0_1 = arith.constant 0 : index
    %c0_2 = arith.constant 0 : index
    %c0_3 = arith.constant 0 : index
    %c0_4 = arith.constant 0 : index
    %4 = vector.load %arg3[%c0_1, %c0_2, %c0_3, %c0_4] : memref<1x1x2x256xbf16, #tpu.memory_space<vmem>>, vector<1x1x2x256xbf16>
    %5 = vector.shape_cast %4 : vector<1x1x2x256xbf16> to vector<2x256xbf16>
    %6 = arith.extf %5 : vector<2x256xbf16> to vector<2x256xf32>
    %cst = arith.constant 0.000000e+00 : f32
    %7 = vector.broadcast %cst : f32 to vector<18x256xf32>
    %c0_5 = arith.constant 0 : index
    %c0_6 = arith.constant 0 : index
    %8 = vector.load %arg9[%c0_5, %c0_6] : memref<18x256xf32, #tpu.memory_space<vmem>>, vector<18x256xf32>
    tpu.vector_store %arg9[%c0_5, %c0_6], %7 {strides = array<i32>} : memref<18x256xf32, #tpu.memory_space<vmem>>, vector<18x256xf32>,
    %9 = vector.extract_strided_slice %6 {offsets = [0, 0], sizes = [2, 239], strides = [1, 1]} : vector<2x256xf32> to vector<2x239xf32>
    %c0_7 = arith.constant 0 : index
    %c17 = arith.constant 17 : index
    %10 = vector.load %arg7[%c0_7, %c17] : memref<9x256xf32, #tpu.memory_space<vmem>>, vector<1x239xf32>
    %11 = vector.broadcast %10 : vector<1x239xf32> to vector<2x239xf32>
    %12 = arith.mulf %9, %11 : vector<2x239xf32>
    %c0_8 = arith.constant 0 : index
    %c17_9 = arith.constant 17 : index
    %13 = vector.load %arg9[%c0_8, %c17_9] : memref<18x256xf32, #tpu.memory_space<vmem>>, vector<2x239xf32>
    tpu.vector_store %arg9[%c0_8, %c17_9], %12 {strides = array<i32>} : memref<18x256xf32, #tpu.memory_space<vmem>>, vector<2x239xf32>,
    %14 = vector.extract_strided_slice %6 {offsets = [0, 0], sizes = [2, 240], strides = [1, 1]} : vector<2x256xf32> to vector<2x240xf32>
    %c2 = arith.constant 2 : index
    %c16 = arith.constant 16 : index
    %15 = vector.load %arg9[%c2, %c16] : memref<18x256xf32, #tpu.memory_space<vmem>>, vector<2x240xf32>
    tpu.vector_store %arg9[%c2, %c16], %14 {strides = array<i32>} : memref<18x256xf32, #tpu.memory_space<vmem>>, vector<2x240xf32>,
    %16 = vector.extract_strided_slice %6 {offsets = [0, 0], sizes = [2, 241], strides = [1, 1]} : vector<2x256xf32> to vector<2x241xf32>
    %c2_10 = arith.constant 2 : index
    %c15 = arith.constant 15 : index
    %17 = vector.load %arg7[%c2_10, %c15] : memref<9x256xf32, #tpu.memory_space<vmem>>, vector<1x241xf32>
    %18 = vector.broadcast %17 : vector<1x241xf32> to vector<2x241xf32>
    %19 = arith.mulf %16, %18 : vector<2x241xf32>
    %c4 = arith.constant 4 : index
    %c15_11 = arith.constant 15 : index
    %20 = vector.load %arg9[%c4, %c15_11] : memref<18x256xf32, #tpu.memory_space<vmem>>, vector<2x241xf32>
    tpu.vector_store %arg9[%c4, %c15_11], %19 {strides = array<i32>} : memref<18x256xf32, #tpu.memory_space<vmem>>, vector<2x241xf32>,
    %21 = vector.extract_strided_slice %6 {offsets = [0, 0], sizes = [2, 255], strides = [1, 1]} : vector<2x256xf32> to vector<2x255xf32>
    %c3 = arith.constant 3 : index
    %c1 = arith.constant 1 : index
    %22 = vector.load %arg7[%c3, %c1] : memref<9x256xf32, #tpu.memory_space<vmem>>, vector<1x255xf32>
    %23 = vector.broadcast %22 : vector<1x255xf32> to vector<2x255xf32>
    %24 = arith.mulf %21, %23 : vector<2x255xf32>
    %c6 = arith.constant 6 : index
    %c1_12 = arith.constant 1 : index
    %25 = vector.load %arg9[%c6, %c1_12] : memref<18x256xf32, #tpu.memory_space<vmem>>, vector<2x255xf32>
    tpu.vector_store %arg9[%c6, %c1_12], %24 {strides = array<i32>} : memref<18x256xf32, #tpu.memory_space<vmem>>, vector<2x255xf32>,
    %c8 = arith.constant 8 : index
    %c0_13 = arith.constant 0 : index
    %26 = vector.load %arg9[%c8, %c0_13] : memref<18x256xf32, #tpu.memory_space<vmem>>, vector<2x256xf32>
    tpu.vector_store %arg9[%c8, %c0_13], %6 {strides = array<i32>} : memref<18x256xf32, #tpu.memory_space<vmem>>, vector<2x256xf32>,
    %27 = vector.extract_strided_slice %6 {offsets = [0, 1], sizes = [2, 255], strides = [1, 1]} : vector<2x256xf32> to vector<2x255xf32>
    %c5 = arith.constant 5 : index
    %c0_14 = arith.constant 0 : index
    %28 = vector.load %arg7[%c5, %c0_14] : memref<9x256xf32, #tpu.memory_space<vmem>>, vector<1x255xf32>
    %29 = vector.broadcast %28 : vector<1x255xf32> to vector<2x255xf32>
    %30 = arith.mulf %27, %29 : vector<2x255xf32>
    %c10 = arith.constant 10 : index
    %c0_15 = arith.constant 0 : index
    %31 = vector.load %arg9[%c10, %c0_15] : memref<18x256xf32, #tpu.memory_space<vmem>>, vector<2x255xf32>
    tpu.vector_store %arg9[%c10, %c0_15], %30 {strides = array<i32>} : memref<18x256xf32, #tpu.memory_space<vmem>>, vector<2x255xf32>,
    %32 = vector.extract_strided_slice %6 {offsets = [0, 15], sizes = [2, 241], strides = [1, 1]} : vector<2x256xf32> to vector<2x241xf32>
    %c6_16 = arith.constant 6 : index
    %c0_17 = arith.constant 0 : index
    %33 = vector.load %arg7[%c6_16, %c0_17] : memref<9x256xf32, #tpu.memory_space<vmem>>, vector<1x241xf32>
    %34 = vector.broadcast %33 : vector<1x241xf32> to vector<2x241xf32>
    %35 = arith.mulf %32, %34 : vector<2x241xf32>
    %c12 = arith.constant 12 : index
    %c0_18 = arith.constant 0 : index
    %36 = vector.load %arg9[%c12, %c0_18] : memref<18x256xf32, #tpu.memory_space<vmem>>, vector<2x241xf32>
    tpu.vector_store %arg9[%c12, %c0_18], %35 {strides = array<i32>} : memref<18x256xf32, #tpu.memory_space<vmem>>, vector<2x241xf32>,
    %37 = vector.extract_strided_slice %6 {offsets = [0, 16], sizes = [2, 240], strides = [1, 1]} : vector<2x256xf32> to vector<2x240xf32>
    %c14 = arith.constant 14 : index
    %c0_19 = arith.constant 0 : index
    %38 = vector.load %arg9[%c14, %c0_19] : memref<18x256xf32, #tpu.memory_space<vmem>>, vector<2x240xf32>
    tpu.vector_store %arg9[%c14, %c0_19], %37 {strides = array<i32>} : memref<18x256xf32, #tpu.memory_space<vmem>>, vector<2x240xf32>,
    %39 = vector.extract_strided_slice %6 {offsets = [0, 17], sizes = [2, 239], strides = [1, 1]} : vector<2x256xf32> to vector<2x239xf32>
    %c8_20 = arith.constant 8 : index
    %c0_21 = arith.constant 0 : index
    %40 = vector.load %arg7[%c8_20, %c0_21] : memref<9x256xf32, #tpu.memory_space<vmem>>, vector<1x239xf32>
    %41 = vector.broadcast %40 : vector<1x239xf32> to vector<2x239xf32>
    %42 = arith.mulf %39, %41 : vector<2x239xf32>
    %c16_22 = arith.constant 16 : index
    %c0_23 = arith.constant 0 : index
    %43 = vector.load %arg9[%c16_22, %c0_23] : memref<18x256xf32, #tpu.memory_space<vmem>>, vector<2x239xf32>
    tpu.vector_store %arg9[%c16_22, %c0_23], %42 {strides = array<i32>} : memref<18x256xf32, #tpu.memory_space<vmem>>, vector<2x239xf32>,
    %c0_24 = arith.constant 0 : index
    %c0_25 = arith.constant 0 : index
    %44 = vector.load %arg4[%c0_24, %c0_25] : memref<8x18xf32, #tpu.memory_space<vmem>>, vector<8x18xf32>
    %c0_26 = arith.constant 0 : index
    %c0_27 = arith.constant 0 : index
    %45 = vector.load %arg9[%c0_26, %c0_27] : memref<18x256xf32, #tpu.memory_space<vmem>>, vector<18x256xf32>
    %cst_28 = arith.constant dense<0.000000e+00> : vector<8x256xf32>
    %46 = tpu.matmul %44, %45, %cst_28 {dimension_numbers = #tpu.dot_dimension_numbers<[1], [0], [0], [1], [0, 0, 1, 1], [], []>} : vector<8x18xf32>, vector<18x256xf32>, vector<8x256xf32> -> vector<8x256xf32>
    %c0_29 = arith.constant 0 : index
    %c0_30 = arith.constant 0 : index
    %47 = vector.load %arg5[%c0_29, %c0_30] : memref<8x1xf32, #tpu.memory_space<vmem>>, vector<8x1xf32>
    %48 = vector.broadcast %47 : vector<8x1xf32> to vector<8x256xf32>
    %49 = arith.mulf %46, %48 : vector<8x256xf32>
    %c0_31 = arith.constant 0 : index
    %c0_32 = arith.constant 0 : index
    %50 = vector.load %arg6[%c0_31, %c0_32] : memref<8x1xf32, #tpu.memory_space<vmem>>, vector<8x1xf32>
    %51 = vector.broadcast %50 : vector<8x1xf32> to vector<8x256xf32>
    %52 = arith.addf %49, %51 : vector<8x256xf32>
    %cst_33 = arith.constant 1.000000e+00 : f32
    %53 = arith.subf %cst_33, %3 : f32
    %c0_34 = arith.constant 0 : index
    %c0_35 = arith.constant 0 : index
    %54 = vector.load %arg10[%c0_34, %c0_35] : memref<8x256xf32, #tpu.memory_space<vmem>>, vector<8x256xf32>
    %55 = vector.broadcast %53 : f32 to vector<8x256xf32>
    %56 = arith.mulf %55, %54 : vector<8x256xf32>
    %57 = arith.addf %56, %52 : vector<8x256xf32>
    %cst_36 = arith.constant 1.000000e+00 : f32
    %58 = vector.broadcast %cst_36 : f32 to vector<8x256xf32>
    %59 = arith.cmpf oge, %57, %58 : vector<8x256xf32>
    %60 = arith.extui %59 : vector<8x256xi1> to vector<8x256xi32>
    %61 = arith.sitofp %60 : vector<8x256xi32> to vector<8x256xf32>
    %cst_37 = arith.constant 1.000000e+00 : f32
    %62 = vector.broadcast %cst_37 : f32 to vector<8x256xf32>
    %63 = arith.subf %62, %61 : vector<8x256xf32>
    %64 = arith.mulf %57, %63 : vector<8x256xf32>
    %c0_38 = arith.constant 0 : index
    %c0_39 = arith.constant 0 : index
    %65 = vector.load %arg10[%c0_38, %c0_39] : memref<8x256xf32, #tpu.memory_space<vmem>>, vector<8x256xf32>
    tpu.vector_store %arg10[%c0_38, %c0_39], %64 {strides = array<i32>} : memref<8x256xf32, #tpu.memory_space<vmem>>, vector<8x256xf32>,
    %66 = arith.truncf %61 : vector<8x256xf32> to vector<8x256xbf16>
    %c0_40 = arith.constant 0 : index
    %c0_41 = arith.constant 0 : index
    %c0_42 = arith.constant 0 : index
    %c0_43 = arith.constant 0 : index
    %67 = vector.load %arg8[%c0_40, %c0_41, %c0_42, %c0_43] : memref<1x1x8x256xbf16, #tpu.memory_space<vmem>>, vector<1x1x8x256xbf16>
    %68 = vector.shape_cast %67 : vector<1x1x8x256xbf16> to vector<8x256xbf16>
    %69 = vector.shape_cast %66 : vector<8x256xbf16> to vector<1x1x8x256xbf16>
    tpu.vector_store %arg8[%c0_40, %c0_41, %c0_42, %c0_43], %69 {strides = array<i32>} : memref<1x1x8x256xbf16, #tpu.memory_space<vmem>>, vector<1x1x8x256xbf16>,
    return
  }
  func.func @transform_0(%arg0: i32, %arg1: i32) -> i32 {
    %c0_i32 = arith.constant 0 : i32
    %c0_i32_0 = arith.constant 0 : i32
    return %c0_i32 : i32
  }
  func.func @transform_1(%arg0: i32, %arg1: i32) -> (i32, i32, i32, i32) {
    %c0_i32 = arith.constant 0 : i32
    %c0_i32_0 = arith.constant 0 : i32
    %c0_i32_1 = arith.constant 0 : i32
    return %arg1, %arg0, %c0_i32, %c0_i32_0 : i32, i32, i32, i32
  }
  func.func @transform_2(%arg0: i32, %arg1: i32) -> (i32, i32) {
    %c0_i32 = arith.constant 0 : i32
    %c0_i32_0 = arith.constant 0 : i32
    %c0_i32_1 = arith.constant 0 : i32
    return %c0_i32, %c0_i32_0 : i32, i32
  }
  func.func @transform_3(%arg0: i32, %arg1: i32) -> (i32, i32) {
    %c0_i32 = arith.constant 0 : i32
    %c0_i32_0 = arith.constant 0 : i32
    %c0_i32_1 = arith.constant 0 : i32
    return %c0_i32, %c0_i32_0 : i32, i32
  }
  func.func @transform_4(%arg0: i32, %arg1: i32) -> (i32, i32) {
    %c0_i32 = arith.constant 0 : i32
    %c0_i32_0 = arith.constant 0 : i32
    %c0_i32_1 = arith.constant 0 : i32
    return %c0_i32, %c0_i32_0 : i32, i32
  }
  func.func @transform_5(%arg0: i32, %arg1: i32) -> (i32, i32) {
    %c0_i32 = arith.constant 0 : i32
    %c0_i32_0 = arith.constant 0 : i32
    %c0_i32_1 = arith.constant 0 : i32
    return %c0_i32, %c0_i32_0 : i32, i32
  }
  func.func @transform_6(%arg0: i32, %arg1: i32) -> (i32, i32, i32, i32) {
    %c0_i32 = arith.constant 0 : i32
    %c0_i32_0 = arith.constant 0 : i32
    %c0_i32_1 = arith.constant 0 : i32
    return %arg1, %arg0, %c0_i32, %c0_i32_0 : i32, i32, i32, i32
  }
}

</mosaic_0001>

<bundles_post_ra>
// kernel: tpu_custom_call.1
= control target key start
LH: loop header
LB: loop body
LE: loop exit
PB: predicated region body
PF: predicated region fallthrough
CT: control target
= control target key end

     0   :  { %s1580_s0 = inlined_call_operand.<no memory space> [shape: f32[1], index: 0, kind: input, shape index: {}]   ;;  %s1581_s1 = inlined_call_operand.hbm [shape: bf16[4,2,2,256], index: 1, kind: input, shape index: {}]   ;;  %s1582_s2 = inlined_call_operand.hbm [shape: f32[8,18], index: 2, kind: input, shape index: {}]   ;;  %s1583_s3 = inlined_call_operand.vmem [shape: f32[8,1], index: 3, kind: input, shape index: {}]   ;;  %s1584_s4 = inlined_call_operand.vmem [shape: f32[8,1], index: 4, kind: input, shape index: {}]   ;;  %s1585_s5 = inlined_call_operand.vmem [shape: f32[9,256], index: 5, kind: input, shape index: {}]   ;;  %s1586_s6 = inlined_call_operand.hbm [shape: bf16[4,2,8,256], index: 6, kind: output, shape index: {}]  }
   0x1   :  { %1598 = sst [smem:[#allocation19_spill]] %s1582_s2 }
   0x2   :  { %1599 = sst [smem:[#allocation20_spill]] %s1586_s6 }
   0x3   :  { %11 = sst [smem:[#allocation4]] %s1580_s0 }
   0x4   :  { %12 = vsyncpa [#allocation6], 0 }
   0x5   :  { %14 = vsyncpa [#allocation6 + $0x1], 0 }
   0x6   :  { %15 = vsyncpa [#allocation9], 0 }
   0x7   :  { %16 = vsyncpa [#allocation7], 0 }
   0x8   :  { %18 = vsyncpa [#allocation7 + $0x1], 0  ;;  %s1234_s23 = smov 0   ;;  %s1236_s24 = smov 0  }
   0x9   :  { %s1238_s25 = smov 0   ;;  %s1240_s26 = smov 0  }
   0xa   :  { %s1242_s27 = smov 0   ;;  %s1244_s28 = smov 0  }
   0xb   :  { %s1246_s29 = smov 0   ;;  %s1248_s0 = smov 0  }
   0xc LB: > { %1600 = sst [smem:[#allocation14_spill]] %s1151_s23  ;;  %s879_s30 = sadd.s32 4294967295, %s1179_s0   ;;  %s1179_s0 = sphi %s1248_s0, %s24_s0   ;;  %s1175_s29 = sphi %s1246_s29, %s1632_s29   ;;  %s1171_s28 = sphi %s1244_s28, %s1631_s28   ;;  %s1167_s27 = sphi %s1242_s27, %s1630_s27   ;;  %s1163_s26 = sphi %s1240_s26, %s1629_s26   ;;  %s1159_s25 = sphi %s1238_s25, %s1628_s25   ;;  %s1155_s24 = sphi %s1236_s24, %s1627_s24   ;;  %s1151_s23 = sphi %s1234_s23, %s1626_s23  }
   0xd   : > { %s880_s7 = sadd.s32 4294967294, %s1179_s0   ;;  %p79_p0 = scmp.ne.s32.totalorder %s1155_s24, %s1151_s23 }
   0xe   : > { %p1278_p1 = scmp.eq.s32.totalorder %s879_s30, 0  ;;  %p1282_p2 = scmp.eq.s32.totalorder %s879_s30, 7 }
   0xf   : > { %p195_p3 = scmp.eq.s32.totalorder %s880_s7, 7  ;;  %p881_p5 = scmp.ge.s32.totalorder %s1179_s0, 1 }
  0x10   : > { %s1601_s8 = scalar_select %p1278_p1, 1, 0 }
  0x11   : > { %s1602_s9 = scalar_select %p1282_p2, 1, 0 }
  0x12   : > { %p1288_p4 = por %p1278_p1, %p79_p0  ;;  %p1293_p6 = por %p195_p3, %p79_p0 }
  0x13   : > { %p202_p7 = scmp.lt.s32.totalorder %s1179_s0, 9  ;;  %s1181_s13 = smov [#allocation8]  }
  0x14   : > { %s1603_s10 = scalar_select %p1288_p4, 1, 0 }
  0x15   : > { %s1604_s11 = scalar_select %p1293_p6, 1, 0 }
  0x16   : > { %p1298_p8 = pnand %p881_p5, %p202_p7  ;;  %s218_s14 = sshll.u32 %s1181_s13, 4  ;;  %s219_s14 = int_to_ptr.vmem [resolvable:$true] %s218_s14 }
  0x17   : > { %1605 = sst [smem:[#allocation15_spill]] %s1604_s11  ;;  %s33_s16 = sadd.s32 1, %s1171_s28 }
  0x18   : > { %s1606_s12 = scalar_select %p1298_p8, 1, 0 }
  0x19   : > { %p924_p9 = pneg %p1298_p8  ;;  %s1608_s2 = sld [smem:[#allocation19_spill]] }
  0x1b   : > { %p1306_p10 = pnand %p924_p9, %p1278_p1 }
  0x1d   : > { %p1021_p12 = pneg %p1306_p10 }
  0x1f   : > { %s1019_s19 = scalar_lea.hbm %s1608_s2, 128 }
  0x20   : > { %p1020_p11 = scmp.ne.s32.totalorder %s1608_s2, %s1019_s19  ;;  %p1026_p3 = scmp.lt.u32.totalorder %s1019_s19, %s1608_s2 }
  0x22   : > { %p1022_p13 = pnand %p1021_p12, %p1020_p11 }
  0x24   : > { %p1023_p0 = pneg %p1022_p13 }
  0x26   : > { %p1028_p5 = pnand %p1026_p3, %p1023_p0 }
  0x28   : > { %1031 = shalt.err (!%p1028_p5)
}
  0x29   : > { %s1032_s7 = scalar_lea.vmem %s219_s14, 128  ;;  %p1040_p1 = scmp.lt.s32.totalorder %s219_s14, %s219_s14 }
  0x2a   : > { %p1033_p7 = scmp.ne.s32.totalorder %s219_s14, %s1032_s7  ;;  %p1041_p4 = scmp.lt.s32.totalorder %s1032_s7, %s1032_s7 }
  0x2c   : > { %p1035_p9 = pnand %p1033_p7, %p1021_p12  ;;  %p1042_p8 = por %p1041_p4, %p1040_p1 }
  0x2e   : > { %p1036_p6 = pneg %p1035_p9 }
  0x30   : > { %p1043_p2 = pnand %p1042_p8, %p1036_p6 }
  0x32   : > { %1046 = shalt.err (!%p1043_p2)
}
  0x33   : > { %927 = dma.hbm_to_vmem [thread:$0]  (!%p1306_p10), %s1608_s2, 128, %s219_s14, [#allocation9]  }
  0x34   : > { %p34_p1 = scmp.ge.s32.totalorder %s33_s16, 4  ;;  %s36_s18 = sadd.s32 1, %s1175_s29 }
  0x35   : > { %s66_s19 = sadd.s32 1, %s1159_s25  ;;  %p73_p2 = scmp.ne.s32.totalorder %s1159_s25, %s1155_s24 }
  0x36   : > { %s1634_s16 = smov (%p34_p1, %s33_s16), 0  ;;  %s1636_s18 = smov (!%p34_p1, %s36_s18), %s1175_s29 }
  0x37   : > { %1609 = sst [smem:[#allocation16_spill]] %s1634_s16  ;;  %s61_s15 = ssub.s32 %s1171_s28, %s1634_s16 }
  0x38   : > { %p74_p4 = scmp.eq.s32.totalorder %s1179_s0, 0  ;;  %p38_p6 = scmp.ge.s32.totalorder %s1636_s18, 2 }
  0x39   : > { %p1610_p8 = scmp.ne.s32.totalorder %s1602_s9, 0  ;;  %p937_p12 = scmp.lt.s32.totalorder %s1179_s0, 8 }
  0x3a   : > { %p1343_p10 = por %p74_p4, %p73_p2  ;;  %s1638_s18 = smov (%p38_p6, %s1636_s18), 0 }
  0x3b   : > { %p1339_p11 = por %p1610_p8, %p73_p2  ;;  %1614 = sst [smem:[#allocation18_spill]] %s1638_s18 }
  0x3c   : > { %s238_s21 = sand.u32 1, %s1159_s25   ;;  %s885_s22 = sshll.u32 %s1175_s29, 1 }
  0x3d   : > { %s1611_s20 = scalar_select %p1339_p11, 1, 0 }
  0x3e   : > { %s62_s30 = ssub.s32 %s1175_s29, %s1638_s18  ;;  %s884_s13 = sshll.u32 %s238_s21, 1 }
  0x3f   : > { %1612 = sst [smem:[#allocation17_spill]] %s1611_s20  ;;  %s63_s7 = sor.u32 %s62_s30, %s61_s15 }
  0x40   : > { %p64_p13 = scmp.eq.s32.totalorder %s63_s7, 0  ;;  %s886_s9 = sshll.u32 %s1171_s28, 2 }
  0x41   : > { %s242_s17 = scalar_lea.vmem [#allocation5], %s884_s13  ;;  %s248_s11 = sadd.s32 %s886_s9, %s885_s22 }
  0x42   : > { %s252_s2 = sshll.u32 %s242_s17, 4  ;;  %s887_s23 = sshll.u32 %s248_s11, 4  ;;  %s1358_s2 = int_to_ptr.vmem [resolvable:$true] %s252_s2 }
  0x43   : > { %s1356_s16 = scalar_select %p64_p13, %s1159_s25, %s66_s19  }
  0x44   : > { %p1364_p0 = pnand %p937_p12, %p1343_p10  ;;  %s1371_s15 = scalar_lea.hbm %s1581_s1, %s887_s23 }
  0x45   : > { %s239_s19 = scalar_lea.sflag [#allocation6], %s238_s21  ;;  %s1047_s22 = scalar_lea.hbm %s1371_s15, 32 }
  0x46   : > { %p1048_p3 = scmp.ne.s32.totalorder %s1371_s15, %s1047_s22  ;;  %p1049_p5 = pneg %p1364_p0 }
  0x47   : > { %s1052_s18 = scalar_lea.hbm %s1581_s1, 256  ;;  %p1053_p1 = scmp.lt.u32.totalorder %s1371_s15, %s1581_s1 }
  0x48   : > { %p1050_p7 = pnand %p1049_p5, %p1048_p3  ;;  %p1054_p2 = scmp.lt.u32.totalorder %s1052_s18, %s1047_s22 }
  0x49   : > { %p1056_p6 = scmp.lt.u32.totalorder %s1047_s22, %s1371_s15 }
  0x4a   : > { %p1051_p9 = pneg %p1050_p7  ;;  %p1055_p4 = por %p1054_p2, %p1053_p1 }
  0x4c   : > { %p1057_p8 = por %p1056_p6, %p1055_p4 }
  0x4e   : > { %p1058_p10 = pnand %p1057_p8, %p1051_p9 }
  0x50   : > { %1061 = shalt.err (!%p1058_p10)
}
  0x51   : > { %s1062_s21 = scalar_lea.vmem %s1358_s2, 32  ;;  %s1182_s30 = smov [#allocation5]  }
  0x52   : > { %p1063_p12 = scmp.ne.s32.totalorder %s1358_s2, %s1062_s21  ;;  %s1067_s7 = sshll.u32 %s1182_s30, 4  ;;  %s1068_s7 = int_to_ptr.vmem [resolvable:$false] %s1067_s7 }
  0x53   : > { %s1069_s13 = scalar_lea.vmem %s1068_s7, 64  ;;  %p1070_p7 = scmp.lt.s32.totalorder %s1358_s2, %s1068_s7 }
  0x54   : > { %p1065_p13 = pnand %p1063_p12, %p1049_p5  ;;  %p1071_p1 = scmp.lt.s32.totalorder %s1069_s13, %s1062_s21 }
  0x56   : > { %p1066_p3 = pneg %p1065_p13  ;;  %p1072_p2 = por %p1071_p1, %p1070_p7 }
  0x58   : > { %p1073_p4 = pnand %p1072_p2, %p1066_p3 }
  0x5a   : > { %1076 = shalt.err (!%p1073_p4)
}
  0x5b   : > { %931 = dma.hbm_to_vmem [thread:$0]  (!%p1364_p0), %s1371_s15, 32, %s1358_s2, %s239_s19  }
  0x5c   : > { %p1616_p9 = scmp.ne.s32.totalorder %s1606_s12, 0 }
  0x5d   : > { %s1401_s9 = sand.u32 (!%p1616_p9), 1, %s1155_s24   ;;  %p1617_p5 = scmp.ne.s32.totalorder (!%p1616_p9), %s1603_s10, 0 }
  0x5e   : > { %261 = sbr.rel (%p1616_p9) target bundleno = 641 (0x281), region = 44  ;;  %s889_s17 = sshll.u32 (!%p1616_p9), %s1401_s9, 1 }
  0x5f   : > { %s264_s22 = scalar_lea.sflag (!%p1616_p9), [#allocation6], %s1401_s9  ;;  %s1405_s11 = scalar_lea.vmem (!%p1616_p9), [#allocation5], %s889_s17 }
  0x65   : > { %1138 = dma.done.wait (%p1617_p5), %s264_s22, 32  }
  0x66   : > { %1140 = vsyncadd (%p1617_p5), %s264_s22, 4294967264  ;;  %p1618_p0 = scmp.ne.s32.totalorder %s1601_s8, 0 }
  0x68   : > { %1142 = dma.done.wait (%p1618_p0), [#allocation9], 128  }
  0x69   : > { %1144 = vsyncadd (%p1618_p0), [#allocation9], 4294967168  ;;  %s891_s2 = sshll.u32 %s1401_s9, 3  ;;  %p892_p6 = scmp.ne.s32.totalorder %s1163_s26, 0 }
  0x6a   : > { %s1416_s6 = scalar_lea.vmem [#allocation10], %s891_s2  ;;  %v1183_v0 = vmov (!%p892_p6), 0.0  }
  0x6b   : > { %303 = sbr.rel (%p892_p6) target bundleno = 114 (0x72), region = 56  ;;  %304 = vst [vmem:[#allocation3] sm:$0xff] (!%p892_p6), %v1183_v0  ;;  %305 = vst [vmem:[#allocation3 + $0x8] sm:$0xff] (!%p892_p6), %v1183_v0 }
  0x72 PF: > { %v317_v1 = vlaneseq  ;;  %v1184_v2 = vmov 1983009808   ;;  %v894_v5 = vld [vmem:[%s1585_s5 + $0x3] ss:$8 sm:$0x3]  ;;  %s1185_s13 = smov 127  }
  0x73   : > { %v327_v3 = vunpack.c.l.s4 %v1184_v2  ;;  %v315_v7 = vld [vmem:[%s1585_s5] ss:$8 sm:$0x3]  ;;  %v896_v8 = vld [vmem:[%s1585_s5 + $0x5] ss:$8 sm:$0x3] }
  0x74   : > { %v318_v4 = vshrl.u32 %v317_v1, 7  ;;  %v893_v11 = vld [vmem:[%s1585_s5 + $0x2] ss:$8 sm:$0x3]  ;;  %s1186_s17 = smov 111   ;;  %s1187_s22 = smov 1  }
  0x75   : > { %v328_v6 = vunpack.c.0.s8 %v327_v3  ;;  %v897_v13 = vld [vmem:[%s1585_s5 + $0x6] ss:$8 sm:$0x3]  ;;  %v898_v18 = vld [vmem:[%s1585_s5 + $0x10] ss:$8 sm:$0x3] }
  0x76   : > { %v319_v9 = vsub.s32 0, %v318_v4  ;;  %v323_v10 = vsub.s32 1, %v318_v4  ;;  %v307_v23 = vld [vmem:[%s1405_s11] sm:$0x3]  ;;  %s1188_s11 = smov 113   ;;  %s1189_s2 = smov 15  }
  0x77   : > { %v1431_v12 = vsub.s32 %v328_v6, %v318_v4  ;;  %v1442_v34 = vunpack.c.l.bf16 %v307_v23  ;;  %s1190_s10 = smov 17   ;;  %s1191_s12 = smov 16   ;;  %v1192_v44 = vmov 0.0   ;;  %vm336_vm0 = vcmask 908288  }
  0x78   : > { %v440_v14 = vrot.slane %v894_v5, %v319_v9  ;;  %v444_v15 = vrot.slane %v894_v5, %v323_v10  ;;  %v320_v16 = vrot.slane %v315_v7, %v319_v9  ;;  %v324_v17 = vrot.slane %v315_v7, %v323_v10  ;;  %309 = vst [vmem:[#allocation2] sm:$0xff] %v1192_v44  ;;  %s1193_s8 = smov 112   ;;  %s306_s20 = sld [smem:[#allocation4]] }
  0x79   : > { %v492_v19 = vrot.slane %v896_v8, %v319_v9  ;;  %v496_v20 = vrot.slane %v896_v8, %v323_v10  ;;  %v394_v21 = vrot.slane %v893_v11, %v319_v9  ;;  %v398_v22 = vrot.slane %v893_v11, %v323_v10  ;;  %310 = vst [vmem:[#allocation2 + $0x8] sm:$0xff] %v1192_v44  ;;  %s906_s21 = sshll.u32 %s1167_s27, 1  ;;  %s907_s30 = sshll.u32 %s1163_s26, 2 }
  0x7a   : > { %v445_v24 = vcombine.low %v440_v14, %v444_v15  ;;  %v325_v25 = vcombine.low %v320_v16, %v324_v17  ;;  %v537_v26 = vrot.slane %v897_v13, %v319_v9  ;;  %v541_v27 = vrot.slane %v897_v13, %v323_v10  ;;  %311 = vst [vmem:[#allocation2 + $0x10] sm:$0xff] %v1192_v44  ;;  %s778_s7 = sadd.s32 %s907_s30, %s906_s21 }
  0x7b   : > { %v497_v28 = vcombine.low %v492_v19, %v496_v20  ;;  %v399_v29 = vcombine.low %v394_v21, %v398_v22  ;;  %v593_v30 = vrot.slane %v898_v18, %v319_v9  ;;  %v597_v31 = vrot.slane %v898_v18, %v323_v10  ;;  %312 = vst [vmem:[#allocation2 + $0x18] sm:$0xff] %v1192_v44 }
  0x7c   : > { %v452_v32 = vrot.slane %v445_v24, %v1431_v12  ;;  %v332_v33 = vrot.slane %v325_v25, %v1431_v12  ;;  %v542_v35 = vcombine.low %v537_v26, %v541_v27  ;;  %v361_v39 = vcombine.low %v1442_v34, %v1442_v34  ;;  %313 = vst [vmem:[#allocation2 + $0x20] sm:$0x3] %v1192_v44  ;;  %v720_v26 = vld [vmem:[%s1583_s3] sm:$0xff] }
  0x7d   : > { %v504_v36 = vrot.slane %v497_v28, %v1431_v12  ;;  %v406_v37 = vrot.slane %v399_v29, %v1431_v12  ;;  %v598_v38 = vcombine.low %v593_v30, %v597_v31  ;;  %314 = vst [vmem:[#allocation2 + $0x28] sm:$0x3] %v1192_v44  ;;  %713 = vmatprep.mubr.f32.mxu0 %v1192_v44  ;;  %895 = vst.sshfl [vmem:[#allocation2 + $0x10] sm:$0x3 pattern:$0x76325410] %v1442_v34 }
  0x7e   : > { %453 = vrot.lane.b32.xlu0 %v452_v32, %s1185_s13  ;;  %333 = vrot.lane.b32.xlu1 %v332_v33, %s1186_s17  ;;  %v549_v40 = vrot.slane %v542_v35, %v1431_v12  ;;  %v1455_v42 = vrot.slane %v361_v39, %v1431_v12  ;;  %v375_v48 = vrot.slane %v1442_v34, %v1431_v12  ;;  %vm474_vm1 = vcmask 7168   ;;  %s736_s23 = ssub.f32 1.0, %s306_s20 }
  0x7f   : > { %v605_v41 = vrot.slane %v598_v38, %v1431_v12  ;;  %vm410_vm2 = vcmask 924672   ;;  %vm456_vm3 = vcmask 1039360   ;;  %vm427_vm4 = vcmask 121856  }
  0x80   : > { %v376_v43 = vcombine.high %v1455_v42, %v1455_v42  ;;  %v481_v53 = vcombine.high %v375_v48, %v375_v48  ;;  %vm385_vm5 = vcmask 1043586   ;;  %vm381_vm6 = vcmask 130048  }
  0x81   : > { %vm353_vm7 = vcmask 138240   ;;  %v575_v23 = vcombine.low %v1455_v42, %v1455_v42  ;;  %v1194_v27 = vmov 0   ;;  %vm357_vm8 = vcmask 1041544  }
  0x82   : > { %505 = vrot.lane.b32.xlu0 %v504_v36, %s1187_s22  ;;  %407 = vrot.lane.b32.xlu1 %v406_v37, %s1188_s11  ;;  %485 = vst [vmem:[#allocation2 + $0x18] sm:$0x3] %v481_v53  ;;  %vm431_vm9 = vcmask 1045628   ;;  %vm573_vm10 = vcmask 922628   ;;  %vm478_vm11 = vcmask 1047566   ;;  %vm529_vm12 = vcmask 1035266  }
  0x83   : > { %1017 = vset.pattern.permute.xlu0 %v1194_v27  ;;  %1018 = vset.pattern.permute.xlu1 %v1194_v27  ;;  %vm580_vm13 = vcmask 916480   ;;  %vm585_vm14 = vcmask 916486   ;;  %vm629_vm15 = vcmask 902144  }
  0x86   : > { %550 = vrot.lane.b32.xlu0 %v549_v40, %s1189_s2  ;;  %606 = vrot.lane.b32.xlu1 %v605_v41, %s1190_s10 }
  0x8a   : > { %377 = vrot.lane.b32.xlu0 %v1455_v42, %s1191_s12  ;;  %379 = vrot.lane.b32.xlu1 %v376_v43, %s1191_s12 }
  0xf0   : > { %v454_v45 = vpop.permute.xlu0 %453  ;;  %v334_v46 = vpop.permute.xlu1 %333 }
  0xf1   : > { %v335_v47 = vrot.slane %v334_v46, 2  ;;  %v455_v54 = vrot.slane %v454_v45, 2 }
  0xf3   : > { %v337_v49 = vsel %vm336_vm0, %v334_v46, %v335_v47  ;;  %v457_v0 = vsel %vm456_vm3, %v454_v45, %v455_v54 }
  0xf4   : > { %v339_v50 = vmul.f32 %v337_v49, %v1442_v34  ;;  %v506_v51 = vpop.permute.xlu0 %505  ;;  %v408_v52 = vpop.permute.xlu1 %407  ;;  %v459_v4 = vmul.f32 %v457_v0, %v1442_v34 }
  0xf5   : > { %v507_v55 = vrot.slane %v506_v51, 6  ;;  %v409_v56 = vrot.slane %v408_v52, 2 }
  0xf6   : > { %v347_v57 = vrot.slane %v339_v50, %v1431_v12  ;;  %v461_v13 = vcombine.low %v459_v4, %v459_v4 }
  0xf7   : > { %v508_v58 = vsel %vm474_vm1, %v507_v55, %v506_v51  ;;  %v411_v59 = vsel %vm410_vm2, %v408_v52, %v409_v56 }
  0xf8   : > { %v510_v60 = vmul.f32 %v508_v58, %v1442_v34  ;;  %v413_v61 = vmul.f32 %v411_v59, %v1442_v34  ;;  %v551_v62 = vpop.permute.xlu0 %550  ;;  %349 = vrot.lane.b32.xlu0 %v347_v57, %s1190_s10  ;;  %v607_v63 = vpop.permute.xlu1 %606  ;;  %v348_v16 = vcombine.high %v347_v57, %v347_v57  ;;  %v468_v18 = vrot.slane %v461_v13, %v1431_v12  ;;  %v631_v57 = vld [vmem:[#allocation8] sm:$0xff] }
  0xf9   : > { %v552_v1 = vrot.slane %v551_v62, 6  ;;  %v608_v15 = vrot.slane %v607_v63, 6 }
  0xfa   : > { %v421_v2 = vrot.slane %v413_v61, %v1431_v12  ;;  %v512_v5 = vcombine.low %v510_v60, %v510_v60  ;;  %v469_v21 = vcombine.low %v468_v18, %v468_v18  ;;  %v737_v60 = vld [vmem:[#allocation3] sm:$0xff]  ;;  %v739_v61 = vstv %s736_s23 }
  0xfb   : > { %v553_v3 = vsel %vm427_vm4, %v552_v1, %v551_v62  ;;  %v609_v19 = vsel %vm353_vm7, %v608_v15, %v607_v63  ;;  %v738_v62 = vld [vmem:[#allocation3 + $0x8] sm:$0xff] }
  0xfc   : > { %v555_v6 = vmul.f32 %v553_v3, %v1442_v34  ;;  %425 = vrot.lane.b32.xlu1 %v421_v2, %s1189_s2  ;;  %v422_v7 = vcombine.low %v421_v2, %v421_v2  ;;  %v378_v8 = vpop.permute.xlu0 %377  ;;  %v380_v9 = vpop.permute.xlu1 %379  ;;  %v519_v14 = vrot.slane %v512_v5, %v1431_v12  ;;  %v611_v20 = vmul.f32 %v609_v19, %v1442_v34 }
  0xfd   : > { %386 = vst.msk [vmem:[#allocation2] sm:$0xc] %vm385_vm5, %v378_v8  ;;  %v382_v10 = vsel %vm381_vm6, %v378_v8, %v380_v9  ;;  %v740_v3 = vmul.f32 %v739_v61, %v737_v60  ;;  %v741_v5 = vmul.f32 %v739_v61, %v738_v62 }
  0xfe   : > { %423 = vrot.lane.b32.xlu0 %v422_v7, %s1189_s2  ;;  %v563_v11 = vrot.slane %v555_v6, %v1431_v12  ;;  %387 = vst [vmem:[#allocation2 + $0x8] sm:$0xc] %v382_v10  ;;  %v520_v22 = vcombine.high %v519_v14, %v519_v14  ;;  %v619_v24 = vrot.slane %v611_v20, %v1431_v12  ;;  %v728_v12 = vld [vmem:[%s1584_s4] sm:$0xff] }
 0x100   : > { %567 = vrot.lane.b32.xlu1 %v563_v11, %s1188_s11  ;;  %v564_v17 = vcombine.low %v563_v11, %v563_v11  ;;  %v620_v25 = vcombine.high %v619_v24, %v619_v24 }
 0x102   : > { %521 = vrot.lane.b32.xlu0 %v519_v14, %s1185_s13 }
 0x104   : > { %351 = vrot.lane.b32.xlu1 %v348_v16, %s1190_s10  ;;  %s766_s10 = scalar_lea.sflag [#allocation7], %s1401_s9 }
 0x106   : > { %565 = vrot.lane.b32.xlu0 %v564_v17, %s1188_s11  ;;  %s1620_s11 = sld [smem:[#allocation20_spill]] }
 0x108   : > { %472 = vrot.lane.b32.xlu1 %v468_v18, %s1187_s22 }
 0x10a   : > { %470 = vrot.lane.b32.xlu0 %v469_v21, %s1187_s22 }
 0x10c   : > { %523 = vrot.lane.b32.xlu1 %v520_v22, %s1185_s13  ;;  %s908_s13 = sshll.u32 %s778_s7, 6 }
 0x10d   : > { %s1525_s2 = scalar_lea.hbm %s1620_s11, %s908_s13 }
 0x10e   : > { %576 = vrot.lane.b32.xlu0 %v575_v23, %s1193_s8 }
 0x110   : > { %578 = vrot.lane.b32.xlu1 %v1455_v42, %s1193_s8  ;;  %s1195_s8 = smov [#allocation10]  }
 0x111   : > { %s1081_s15 = sshll.u32 %s1195_s8, 4  ;;  %s1082_s15 = int_to_ptr.vmem [resolvable:$false] %s1081_s15 }
 0x112   : > { %621 = vrot.lane.b32.xlu0 %v619_v24, %s1186_s17  ;;  %s1083_s19 = scalar_lea.vmem %s1082_s15, 256 }
 0x114   : > { %623 = vrot.lane.b32.xlu1 %v620_v25, %s1186_s17  ;;  %s782_s17 = sshll.u32 %s1416_s6, 4  ;;  %s1527_s17 = int_to_ptr.vmem [resolvable:$true] %s782_s17 }
 0x115   : > { %s1077_s12 = scalar_lea.vmem %s1527_s17, 128  ;;  %p1084_p13 = scmp.lt.s32.totalorder %s1527_s17, %s1082_s15 }
 0x116   : > { %723 = vperm.xlu0 %1017, %v720_v26   ;;  %p1078_p8 = scmp.ne.s32.totalorder %s1527_s17, %s1077_s12  ;;  %p1085_p3 = scmp.lt.s32.totalorder %s1083_s19, %s1077_s12 }
 0x118   : > { %731 = vperm.xlu1 %1018, %v728_v12   ;;  %p1079_p10 = pnand %p1078_p8, %p1339_p11  ;;  %p1086_p7 = por %p1085_p3, %p1084_p13 }
 0x11a   : > { %p1080_p12 = pneg %p1079_p10 }
 0x11c   : > { %p1087_p1 = pnand %p1086_p7, %p1080_p12 }
 0x16a   : > { %v350_v28 = vpop.permute.xlu0 %349 }
 0x16b   : > { %358 = vst.msk [vmem:[#allocation2] sm:$0x3] %vm357_vm8, %v350_v28 }
 0x16e   : > { %v426_v29 = vpop.permute.xlu1 %425 }
 0x170   : > { %v424_v30 = vpop.permute.xlu0 %423 }
 0x171   : > { %v428_v31 = vsel %vm427_vm4, %v424_v30, %v426_v29  ;;  %432 = vst.msk [vmem:[#allocation2] sm:$0x30] %vm431_vm9, %v424_v30 }
 0x172   : > { %433 = vst [vmem:[#allocation2 + $0x8] sm:$0x30] %v428_v31  ;;  %v568_v32 = vpop.permute.xlu1 %567 }
 0x173   : > { %574 = vst.msk [vmem:[#allocation2 + $0x18] sm:$0x30] %vm573_vm10, %v568_v32 }
 0x174   : > { %v522_v33 = vpop.permute.xlu0 %521 }
 0x176   : > { %v352_v34 = vpop.permute.xlu1 %351 }
 0x177   : > { %v354_v35 = vsel %vm353_vm7, %v350_v28, %v352_v34 }
 0x178   : > { %359 = vst [vmem:[#allocation2 + $0x8] sm:$0x3] %v354_v35  ;;  %v566_v36 = vpop.permute.xlu0 %565 }
 0x179   : > { %v569_v37 = vsel %vm410_vm2, %v566_v36, %v568_v32  ;;  %vm638_vm2 = vcmask 146432  }
 0x17a   : > { %572 = vst [vmem:[#allocation2 + $0x10] sm:$0x30] %v569_v37  ;;  %v473_v38 = vpop.permute.xlu1 %472 }
 0x17c   : > { %v471_v39 = vpop.permute.xlu0 %470 }
 0x17d   : > { %v475_v40 = vsel %vm474_vm1, %v471_v39, %v473_v38  ;;  %479 = vst.msk [vmem:[#allocation2] sm:$0xc0] %vm478_vm11, %v471_v39  ;;  %vm642_vm1 = vcmask 1041408  }
 0x17e   : > { %480 = vst [vmem:[#allocation2 + $0x8] sm:$0xc0] %v475_v40  ;;  %v524_v41 = vpop.permute.xlu1 %523 }
 0x17f   : > { %v525_v42 = vsel %vm456_vm3, %v522_v33, %v524_v41  ;;  %530 = vst.msk [vmem:[#allocation2 + $0x18] sm:$0xc] %vm529_vm12, %v524_v41 }
 0x180   : > { %528 = vst [vmem:[#allocation2 + $0x10] sm:$0xc] %v525_v42  ;;  %v577_v43 = vpop.permute.xlu0 %576 }
 0x182   : > { %v579_v45 = vpop.permute.xlu1 %578 }
 0x183   : > { %v581_v46 = vsel %vm580_vm13, %v577_v43, %v579_v45  ;;  %586 = vst.msk [vmem:[#allocation2 + $0x18] sm:$0xc0] %vm585_vm14, %v579_v45 }
 0x184   : > { %584 = vst [vmem:[#allocation2 + $0x10] sm:$0xc0] %v581_v46  ;;  %v622_v47 = vpop.permute.xlu0 %621  ;;  %v632_v53 = vld [vmem:[#allocation2] sm:$0xff] }
 0x185   : > { %v633_v50 = vld [vmem:[#allocation2 + $0x8] sm:$0xff] }
 0x186   : > { %v624_v48 = vpop.permute.xlu1 %623 }
 0x187   : > { %v625_v49 = vsel %vm336_vm0, %v622_v47, %v624_v48  ;;  %630 = vst.msk [vmem:[#allocation2 + $0x28] sm:$0x3] %vm629_vm15, %v624_v48 }
 0x188   : > { %628 = vst [vmem:[#allocation2 + $0x20] sm:$0x3] %v625_v49 }
 0x18a   : > { %v635_v51 = vld [vmem:[#allocation2 + $0x18] sm:$0xff] }
 0x18b   : > { %v912_v52 = vpack.c.bf16 %v635_v51, %v633_v50  ;;  %v634_v54 = vld [vmem:[#allocation2 + $0x10] sm:$0xff] }
 0x18c   : > { %v914_v55 = vpack.c.bf16 %v634_v54, %v632_v53 }
 0x18d   : > { %913 = vmatprep.subr.bf16.mxu0 %v912_v52 }
 0x18e   : > { %915 = vmatpush1.bf16.msra.mxu0 %v914_v55  ;;  %v637_v56 = vld [vmem:[#allocation2 + $0x28] sm:$0x3] }
 0x18f   : > { %899 = vmatprep.subr.msk.mxu0 %vm642_vm1, %v637_v56  ;;  %v636_v58 = vld [vmem:[#allocation2 + $0x20] sm:$0x3] }
 0x192   : > { %900 = vmatpush1.msk.msra.mxu0 %vm642_vm1, %v636_v58 }
 0x193   : > { %901 = vmatmul.mubr.msk.f32.vlgmr.msra.gmra.mrb[0].mxu0 %vm638_vm2, %v631_v57 }
 0x195   : > { %v724_v59 = vpop.permute.xlu0 %723 }
 0x197   : > { %v732_v0 = vpop.permute.xlu1 %731 }
 0x266   : > { %v715_v63 = vpop.f32.mrb[0].mxu0 }
 0x267   : > { %v726_v1 = vmul.f32 %v724_v59, %v715_v63  ;;  %v717_v2 = vpop.f32.mrb[1].mxu0 }
 0x268   : > { %v727_v4 = vmul.f32 %v724_v59, %v717_v2 }
 0x269   : > { %v734_v6 = vadd.f32 %v732_v0, %v726_v1 }
 0x26a   : > { %v735_v7 = vadd.f32 %v732_v0, %v727_v4 }
 0x26b   : > { %v742_v8 = vadd.f32 %v740_v3, %v734_v6 }
 0x26c   : > { %v743_v9 = vadd.f32 %v741_v5, %v735_v7 }
 0x26d   : > { %vm744_vm0 = vcmp.ge.f32.partialorder %v742_v8, 1.0 }
 0x26e   : > { %vm745_vm3 = vcmp.ge.f32.partialorder %v743_v9, 1.0  ;;  %v902_v10 = vsel %vm744_vm0, 1.0, %v1192_v44 }
 0x26f   : > { %v903_v11 = vsel %vm745_vm3, 1.0, %v1192_v44  ;;  %v750_v13 = vsub.f32 1.0, %v902_v10 }
 0x270   : > { %v751_v14 = vsub.f32 1.0, %v903_v11  ;;  %v911_v15 = vpack.c.bf16 %v903_v11, %v902_v10 }
 0x271   : > { %v752_v16 = vmul.f32 %v750_v13, %v742_v8 }
 0x272   : > { %v753_v17 = vmul.f32 %v751_v14, %v743_v9  ;;  %764 = vst [vmem:[%s1416_s6] sm:$0xff] %v911_v15 }
 0x273   : > { %754 = vst [vmem:[#allocation3] sm:$0xff] %v752_v16 }
 0x274   : > { %1090 = shalt.err (!%p1087_p1)
}
 0x275   : > { %s1091_s9 = scalar_lea.hbm %s1525_s2, 128  ;;  %s1095_s18 = scalar_lea.hbm %s1620_s11, 1024 }
 0x276   : > { %p1092_p2 = scmp.ne.s32.totalorder %s1525_s2, %s1091_s9  ;;  %p1096_p5 = scmp.lt.u32.totalorder %s1525_s2, %s1620_s11 }
 0x277   : > { %p1097_p0 = scmp.lt.u32.totalorder %s1095_s18, %s1091_s9  ;;  %p1099_p8 = scmp.lt.u32.totalorder %s1091_s9, %s1525_s2 }
 0x278   : > { %p1093_p4 = pnand %p1092_p2, %p1339_p11 }
 0x279   : > { %p1098_p6 = por %p1097_p0, %p1096_p5 }
 0x27a   : > { %p1094_p9 = pneg %p1093_p4 }
 0x27b   : > { %p1100_p10 = por %p1099_p8, %p1098_p6 }
 0x27d   : > { %p1101_p12 = pnand %p1100_p10, %p1094_p9 }
 0x27f   : > { %1104 = shalt.err (!%p1101_p12)
}
 0x280   : > { %922 = dma.vmem_to_hbm [thread:$0]  (%p1339_p11), %s1527_s17, 128, %s1525_s2, %s766_s10   ;;  %755 = vst [vmem:[#allocation3 + $0x8] sm:$0xff] %v753_v17 }
 0x281 PF: > { %s1621_s21 = sld [smem:[#allocation14_spill]]  ;;  %s1622_s30 = sld [smem:[#allocation15_spill]] }
 0x282   : > { %p939_p13 = scmp.ge.s32.totalorder %s1179_s0, 2 }
 0x287   : > { %s794_s7 = sand.u32 1, %s1621_s21   ;;  %p1623_p3 = scmp.ne.s32.totalorder %s1622_s30, 0 }
 0x288   : > { %s795_s13 = scalar_lea.sflag [#allocation7], %s794_s7 }
 0x289   : > { %p933_p7 = pnand %p939_p13, %p1623_p3 }
 0x28b   : > { %1146 = dma.done.wait (!%p933_p7), %s795_s13, 128  }
 0x28c   : > { %1148 = vsyncadd (!%p933_p7), %s795_s13, 4294967168  ;;  %s24_s0 = sadd.s32 1, %s1179_s0   ;;  %s1624_s17 = sld [smem:[#allocation16_spill]] }
 0x28d   : > { %p21_p1 = scmp.ge.s32.totalorder %s24_s0, 10   ;;  %s1625_s22 = sld [smem:[#allocation18_spill]] }
 0x28e   : > { %s1626_s23 = smov %s1155_s24  ;;  %s1627_s24 = smov %s1159_s25 }
 0x28f   : > { %s1628_s25 = smov %s1356_s16  ;;  %s1629_s26 = smov %s1171_s28 }
 0x290   : > { %s1630_s27 = smov %s1175_s29  ;;  %23 = sbr.rel (!%p21_p1) target bundleno = 12 (0xc), region = 102 }
 0x292   : > { %s1631_s28 = smov %s1624_s17 }
 0x293   : > { %s1632_s29 = smov %s1625_s22 }
 0x297   :  { %800 = vsyncpa [#allocation6], 1 }
 0x298   :  { %802 = vsyncpa [#allocation6 + $0x1], 1 }
 0x299   :  { %803 = vsyncpa [#allocation9], 1 }
 0x29a   :  { %804 = vsyncpa [#allocation7], 1 }
 0x29b   :  { %806 = vsyncpa [#allocation7 + $0x1], 1 }

</bundles_post_ra>
